<compile_context>
chip_gen: v5e
topology: v5e:2x2
jax: 0.10.0
libtpu: 0.0.40
codegen_flags: <defaults>
</compile_context>

<pallas_src>
import math
import functools

import jax
import jax.numpy as jnp
from jax import lax
from jax.experimental import pallas as pl
from jax.experimental.pallas import tpu as pltpu


# ---------------------------------------------------------------------------
# Fused kernel: per-batch multi-head attention + output projection
# ---------------------------------------------------------------------------
def _mha_fused_kernel(q_ref, k_ref, v_ref, mask_ref, w_ref, o_ref, *,
                      n_heads, scale, compute_dtype, approx_recip):
    # q_ref / k_ref / v_ref block: (1, T, C); mask_ref: (T, T); w_ref: (C, C)
    T, C = q_ref.shape[1], q_ref.shape[2]
    D = C // n_heads

    q = q_ref[0]           # (T, C)
    k = k_ref[0]           # (T, C)
    v = v_ref[0]           # (T, C)
    mask = mask_ref[...]   # (T, T) additive float mask (0 / -inf), kept in f32

    ctx_heads = []
    for h in range(n_heads):                      # static unroll over heads
        lo = h * D
        q_h = q[:, lo:lo + D].astype(compute_dtype)   # (T, D)
        k_h = k[:, lo:lo + D].astype(compute_dtype)   # (T, D)
        v_h = v[:, lo:lo + D].astype(compute_dtype)   # (T, D)

        # scores = q_h @ k_h^T  (contract last dims of both operands; no transpose)
        scores = lax.dot_general(
            q_h, k_h, (((1,), (1,)), ((), ())),
            preferred_element_type=jnp.float32)       # (T, T) f32
        scores = scores * scale + mask

        # numerically stable softmax in f32; normalization deferred past PV matmul
        m = jnp.max(scores, axis=-1, keepdims=True)
        p = jnp.exp(scores - m)                       # (T, T) f32
        denom = jnp.sum(p, axis=-1, keepdims=True)    # (T, 1) f32
        # NOTE: a fully-masked query row gives denom == 0 -> inf/NaN, matching the
        # semantics of F.scaled_dot_product_attention with an all-masked row.

        ctx = jnp.dot(p.astype(compute_dtype), v_h,
                      preferred_element_type=jnp.float32)   # (T, D) f32
        inv = pl.reciprocal(denom, approx=approx_recip)
        ctx_heads.append(ctx * inv)

    ctx = jnp.concatenate(ctx_heads, axis=-1)         # (T, C) f32, lane-dense

    # fused output projection: y = ctx @ W^T with W in PyTorch (C_out, C_in) layout;
    # contract dim 1 of both operands so no host-side / in-kernel transpose is needed.
    y = lax.dot_general(
        ctx.astype(compute_dtype), w_ref[...].astype(compute_dtype),
        (((1,), (1,)), ((), ())),
        preferred_element_type=jnp.float32)           # (T, C) f32
    o_ref[0] = y.astype(o_ref.dtype)


def multi_head_attention(q, k, v, mask, fc_out_weight, *, n_heads,
                         compute_dtype=jnp.float32):
    """q, k, v: (B, T, C); mask: (T, T) additive float; fc_out_weight: (C, C)."""
    B, T, C = q.shape
    assert C % n_heads == 0
    D = C // n_heads
    scale = 1.0 / math.sqrt(D)
    approx_recip = jnp.dtype(compute_dtype) != jnp.dtype(jnp.float32)

    kernel = functools.partial(
        _mha_fused_kernel, n_heads=n_heads, scale=scale,
        compute_dtype=compute_dtype, approx_recip=bool(approx_recip))

    qkv_spec = pl.BlockSpec((1, T, C), lambda b: (b, 0, 0))
    return pl.pallas_call(
        kernel,
        out_shape=jax.ShapeDtypeStruct((B, T, C), q.dtype),
        grid_spec=pltpu.PrefetchScalarGridSpec(
            num_scalar_prefetch=0,
            grid=(B,),
            in_specs=[
                qkv_spec,                                    # q
                qkv_spec,                                    # k
                qkv_spec,                                    # v
                pl.BlockSpec((T, T), lambda b: (0, 0)),      # mask (resident)
                pl.BlockSpec((C, C), lambda b: (0, 0)),      # fc_out weight (resident)
            ],
            out_specs=pl.BlockSpec((1, T, C), lambda b: (b, 0, 0)),
        ),
        compiler_params=pltpu.CompilerParams(
            dimension_semantics=("parallel",),
            vmem_limit_bytes=32 * 1024 * 1024,
        ),
    )(q, k, v, mask, fc_out_weight)


# ---------------------------------------------------------------------------
# Pure-JAX reference (mirrors the PyTorch module's forward)
# ---------------------------------------------------------------------------
def _reference(q, k, v, mask, w, n_heads):
    B, T, C = q.shape
    D = C // n_heads
    qh = q.reshape(B, T, n_heads, D).transpose(0, 2, 1, 3)
    kh = k.reshape(B, T, n_heads, D).transpose(0, 2, 1, 3)
    vh = v.reshape(B, T, n_heads, D).transpose(0, 2, 1, 3)
    scores = jnp.einsum("bhqd,bhkd->bhqk", qh, kh) / math.sqrt(D) + mask
    p = jax.nn.softmax(scores, axis=-1)
    out = jnp.einsum("bhqk,bhkd->bhqd", p, vh)
    out = out.transpose(0, 2, 1, 3).reshape(B, T, C)
    return out @ w.T


if __name__ == "__main__":
    B, T = 2, 8
    n_heads = 4
    embed_size = 32

    key = jax.random.PRNGKey(0)
    kq, kk, kv, kw = jax.random.split(key, 4)

    q = jax.random.normal(kq, (B, T, embed_size), dtype=jnp.float32)
    k = jax.random.normal(kk, (B, T, embed_size), dtype=jnp.float32)
    v = jax.random.normal(kv, (B, T, embed_size), dtype=jnp.float32)

    # nn.Linear(embed_size, embed_size, bias=False) default init: U(-1/sqrt(C), 1/sqrt(C))
    bound = 1.0 / math.sqrt(embed_size)
    fc_out_weight = jax.random.uniform(
        kw, (embed_size, embed_size), dtype=jnp.float32, minval=-bound, maxval=bound)

    # Additive causal mask (0 where attended, -inf where masked), shape (T, T)
    causal = jnp.tril(jnp.ones((T, T), dtype=bool))
    mask = jnp.where(causal, 0.0, -jnp.inf).astype(jnp.float32)

    ref = _reference(q, k, v, mask, fc_out_weight, n_heads)

    # f32 compute path (exact): tight tolerance vs f32 reference
    out_f32 = multi_head_attention(q, k, v, mask, fc_out_weight, n_heads=n_heads)
    out_f32 = jax.block_until_ready(out_f32)
    assert out_f32.shape == (B, T, embed_size)
    assert jnp.allclose(out_f32, ref, atol=1e-4, rtol=1e-4), "f32 path mismatch vs reference"

    # bf16 MXU path (v6e / v7x): matmul operands in bf16, softmax + accumulation in f32
    out_bf16 = multi_head_attention(q, k, v, mask, fc_out_weight, n_heads=n_heads,
                                    compute_dtype=jnp.bfloat16)
    out_bf16 = jax.block_until_ready(out_bf16)
    assert out_bf16.shape == (B, T, embed_size)
    assert jnp.allclose(out_bf16, ref, atol=5e-2, rtol=5e-2), "bf16 path mismatch vs reference"

    print("KERNEL_OK")
</pallas_src>

<mosaic_0001>
module attributes {stable_mosaic.version = 11 : i64} {
  func.func @_mha_fused_kernel(%arg0: i32, %arg1: memref<1x8x32xf32, #tpu.memory_space<vmem>>, %arg2: memref<1x8x32xf32, #tpu.memory_space<vmem>>, %arg3: memref<1x8x32xf32, #tpu.memory_space<vmem>>, %arg4: memref<8x8xf32, #tpu.memory_space<vmem>>, %arg5: memref<32x32xf32, #tpu.memory_space<vmem>>, %arg6: memref<1x8x32xf32, #tpu.memory_space<vmem>>) attributes {dimension_semantics = [#tpu.dimension_semantics<parallel>], iteration_bounds = array<i64: 2>, scalar_prefetch = 0 : i64, scratch_operands = 0 : i64, tpu.core_type = #tpu.core_type<tc>, window_params = [{transform_indices = @transform_0, window_bounds = array<i64: 1, 8, 32>}, {transform_indices = @transform_1, window_bounds = array<i64: 1, 8, 32>}, {transform_indices = @transform_2, window_bounds = array<i64: 1, 8, 32>}, {pipeline_mode = #tpu.pipeline_mode<synchronous>, transform_indices = @transform_3, window_bounds = array<i64: 8, 8>}, {pipeline_mode = #tpu.pipeline_mode<synchronous>, transform_indices = @transform_4, window_bounds = array<i64: 32, 32>}, {transform_indices = @transform_5, window_bounds = array<i64: 1, 8, 32>}]} {
    %c0 = arith.constant 0 : index
    %c0_0 = arith.constant 0 : index
    %c0_1 = arith.constant 0 : index
    %0 = vector.load %arg1[%c0, %c0_0, %c0_1] : memref<1x8x32xf32, #tpu.memory_space<vmem>>, vector<1x8x32xf32>
    %1 = vector.shape_cast %0 : vector<1x8x32xf32> to vector<8x32xf32>
    %c0_2 = arith.constant 0 : index
    %c0_3 = arith.constant 0 : index
    %c0_4 = arith.constant 0 : index
    %2 = vector.load %arg2[%c0_2, %c0_3, %c0_4] : memref<1x8x32xf32, #tpu.memory_space<vmem>>, vector<1x8x32xf32>
    %3 = vector.shape_cast %2 : vector<1x8x32xf32> to vector<8x32xf32>
    %c0_5 = arith.constant 0 : index
    %c0_6 = arith.constant 0 : index
    %c0_7 = arith.constant 0 : index
    %4 = vector.load %arg3[%c0_5, %c0_6, %c0_7] : memref<1x8x32xf32, #tpu.memory_space<vmem>>, vector<1x8x32xf32>
    %5 = vector.shape_cast %4 : vector<1x8x32xf32> to vector<8x32xf32>
    %c0_8 = arith.constant 0 : index
    %c0_9 = arith.constant 0 : index
    %6 = vector.load %arg4[%c0_8, %c0_9] : memref<8x8xf32, #tpu.memory_space<vmem>>, vector<8x8xf32>
    %7 = vector.extract_strided_slice %1 {offsets = [0, 0], sizes = [8, 8], strides = [1, 1]} : vector<8x32xf32> to vector<8x8xf32>
    %8 = vector.extract_strided_slice %3 {offsets = [0, 0], sizes = [8, 8], strides = [1, 1]} : vector<8x32xf32> to vector<8x8xf32>
    %9 = vector.extract_strided_slice %5 {offsets = [0, 0], sizes = [8, 8], strides = [1, 1]} : vector<8x32xf32> to vector<8x8xf32>
    %cst = arith.constant dense<0.000000e+00> : vector<8x8xf32>
    %10 = tpu.matmul %7, %8, %cst {dimension_numbers = #tpu.dot_dimension_numbers<[1], [1], [0], [0], [0, 0, 1, 0], [], []>} : vector<8x8xf32>, vector<8x8xf32>, vector<8x8xf32> -> vector<8x8xf32>
    %cst_10 = arith.constant 0.353553385 : f32
    %11 = vector.broadcast %cst_10 : f32 to vector<8x8xf32>
    %12 = arith.mulf %10, %11 : vector<8x8xf32>
    %13 = arith.addf %12, %6 : vector<8x8xf32>
    %cst_11 = arith.constant dense<0xFF800000> : vector<8xf32>
    %14 = vector.multi_reduction <maximumf>, %13, %cst_11 [1] : vector<8x8xf32> to vector<8xf32>
    %15 = vector.shape_cast %14 : vector<8xf32> to vector<8x1xf32>
    %16 = vector.broadcast %15 : vector<8x1xf32> to vector<8x8xf32>
    %17 = arith.subf %13, %16 : vector<8x8xf32>
    %18 = math.exp %17 : vector<8x8xf32>
    %cst_12 = arith.constant dense<0.000000e+00> : vector<8xf32>
    %19 = vector.multi_reduction <add>, %18, %cst_12 [1] : vector<8x8xf32> to vector<8xf32>
    %20 = vector.shape_cast %19 : vector<8xf32> to vector<8x1xf32>
    %cst_13 = arith.constant dense<0.000000e+00> : vector<8x8xf32>
    %21 = tpu.matmul %18, %9, %cst_13 {dimension_numbers = #tpu.dot_dimension_numbers<[1], [0], [0], [1], [0, 0, 1, 1], [], []>} : vector<8x8xf32>, vector<8x8xf32>, vector<8x8xf32> -> vector<8x8xf32>
    %22 = tpu.reciprocal %20 : vector<8x1xf32> -> vector<8x1xf32>
    %23 = vector.broadcast %22 : vector<8x1xf32> to vector<8x8xf32>
    %24 = arith.mulf %21, %23 : vector<8x8xf32>
    %25 = vector.extract_strided_slice %1 {offsets = [0, 8], sizes = [8, 8], strides = [1, 1]} : vector<8x32xf32> to vector<8x8xf32>
    %26 = vector.extract_strided_slice %3 {offsets = [0, 8], sizes = [8, 8], strides = [1, 1]} : vector<8x32xf32> to vector<8x8xf32>
    %27 = vector.extract_strided_slice %5 {offsets = [0, 8], sizes = [8, 8], strides = [1, 1]} : vector<8x32xf32> to vector<8x8xf32>
    %cst_14 = arith.constant dense<0.000000e+00> : vector<8x8xf32>
    %28 = tpu.matmul %25, %26, %cst_14 {dimension_numbers = #tpu.dot_dimension_numbers<[1], [1], [0], [0], [0, 0, 1, 0], [], []>} : vector<8x8xf32>, vector<8x8xf32>, vector<8x8xf32> -> vector<8x8xf32>
    %cst_15 = arith.constant 0.353553385 : f32
    %29 = vector.broadcast %cst_15 : f32 to vector<8x8xf32>
    %30 = arith.mulf %28, %29 : vector<8x8xf32>
    %31 = arith.addf %30, %6 : vector<8x8xf32>
    %cst_16 = arith.constant dense<0xFF800000> : vector<8xf32>
    %32 = vector.multi_reduction <maximumf>, %31, %cst_16 [1] : vector<8x8xf32> to vector<8xf32>
    %33 = vector.shape_cast %32 : vector<8xf32> to vector<8x1xf32>
    %34 = vector.broadcast %33 : vector<8x1xf32> to vector<8x8xf32>
    %35 = arith.subf %31, %34 : vector<8x8xf32>
    %36 = math.exp %35 : vector<8x8xf32>
    %cst_17 = arith.constant dense<0.000000e+00> : vector<8xf32>
    %37 = vector.multi_reduction <add>, %36, %cst_17 [1] : vector<8x8xf32> to vector<8xf32>
    %38 = vector.shape_cast %37 : vector<8xf32> to vector<8x1xf32>
    %cst_18 = arith.constant dense<0.000000e+00> : vector<8x8xf32>
    %39 = tpu.matmul %36, %27, %cst_18 {dimension_numbers = #tpu.dot_dimension_numbers<[1], [0], [0], [1], [0, 0, 1, 1], [], []>} : vector<8x8xf32>, vector<8x8xf32>, vector<8x8xf32> -> vector<8x8xf32>
    %40 = tpu.reciprocal %38 : vector<8x1xf32> -> vector<8x1xf32>
    %41 = vector.broadcast %40 : vector<8x1xf32> to vector<8x8xf32>
    %42 = arith.mulf %39, %41 : vector<8x8xf32>
    %43 = vector.extract_strided_slice %1 {offsets = [0, 16], sizes = [8, 8], strides = [1, 1]} : vector<8x32xf32> to vector<8x8xf32>
    %44 = vector.extract_strided_slice %3 {offsets = [0, 16], sizes = [8, 8], strides = [1, 1]} : vector<8x32xf32> to vector<8x8xf32>
    %45 = vector.extract_strided_slice %5 {offsets = [0, 16], sizes = [8, 8], strides = [1, 1]} : vector<8x32xf32> to vector<8x8xf32>
    %cst_19 = arith.constant dense<0.000000e+00> : vector<8x8xf32>
    %46 = tpu.matmul %43, %44, %cst_19 {dimension_numbers = #tpu.dot_dimension_numbers<[1], [1], [0], [0], [0, 0, 1, 0], [], []>} : vector<8x8xf32>, vector<8x8xf32>, vector<8x8xf32> -> vector<8x8xf32>
    %cst_20 = arith.constant 0.353553385 : f32
    %47 = vector.broadcast %cst_20 : f32 to vector<8x8xf32>
    %48 = arith.mulf %46, %47 : vector<8x8xf32>
    %49 = arith.addf %48, %6 : vector<8x8xf32>
    %cst_21 = arith.constant dense<0xFF800000> : vector<8xf32>
    %50 = vector.multi_reduction <maximumf>, %49, %cst_21 [1] : vector<8x8xf32> to vector<8xf32>
    %51 = vector.shape_cast %50 : vector<8xf32> to vector<8x1xf32>
    %52 = vector.broadcast %51 : vector<8x1xf32> to vector<8x8xf32>
    %53 = arith.subf %49, %52 : vector<8x8xf32>
    %54 = math.exp %53 : vector<8x8xf32>
    %cst_22 = arith.constant dense<0.000000e+00> : vector<8xf32>
    %55 = vector.multi_reduction <add>, %54, %cst_22 [1] : vector<8x8xf32> to vector<8xf32>
    %56 = vector.shape_cast %55 : vector<8xf32> to vector<8x1xf32>
    %cst_23 = arith.constant dense<0.000000e+00> : vector<8x8xf32>
    %57 = tpu.matmul %54, %45, %cst_23 {dimension_numbers = #tpu.dot_dimension_numbers<[1], [0], [0], [1], [0, 0, 1, 1], [], []>} : vector<8x8xf32>, vector<8x8xf32>, vector<8x8xf32> -> vector<8x8xf32>
    %58 = tpu.reciprocal %56 : vector<8x1xf32> -> vector<8x1xf32>
    %59 = vector.broadcast %58 : vector<8x1xf32> to vector<8x8xf32>
    %60 = arith.mulf %57, %59 : vector<8x8xf32>
    %61 = vector.extract_strided_slice %1 {offsets = [0, 24], sizes = [8, 8], strides = [1, 1]} : vector<8x32xf32> to vector<8x8xf32>
    %62 = vector.extract_strided_slice %3 {offsets = [0, 24], sizes = [8, 8], strides = [1, 1]} : vector<8x32xf32> to vector<8x8xf32>
    %63 = vector.extract_strided_slice %5 {offsets = [0, 24], sizes = [8, 8], strides = [1, 1]} : vector<8x32xf32> to vector<8x8xf32>
    %cst_24 = arith.constant dense<0.000000e+00> : vector<8x8xf32>
    %64 = tpu.matmul %61, %62, %cst_24 {dimension_numbers = #tpu.dot_dimension_numbers<[1], [1], [0], [0], [0, 0, 1, 0], [], []>} : vector<8x8xf32>, vector<8x8xf32>, vector<8x8xf32> -> vector<8x8xf32>
    %cst_25 = arith.constant 0.353553385 : f32
    %65 = vector.broadcast %cst_25 : f32 to vector<8x8xf32>
    %66 = arith.mulf %64, %65 : vector<8x8xf32>
    %67 = arith.addf %66, %6 : vector<8x8xf32>
    %cst_26 = arith.constant dense<0xFF800000> : vector<8xf32>
    %68 = vector.multi_reduction <maximumf>, %67, %cst_26 [1] : vector<8x8xf32> to vector<8xf32>
    %69 = vector.shape_cast %68 : vector<8xf32> to vector<8x1xf32>
    %70 = vector.broadcast %69 : vector<8x1xf32> to vector<8x8xf32>
    %71 = arith.subf %67, %70 : vector<8x8xf32>
    %72 = math.exp %71 : vector<8x8xf32>
    %cst_27 = arith.constant dense<0.000000e+00> : vector<8xf32>
    %73 = vector.multi_reduction <add>, %72, %cst_27 [1] : vector<8x8xf32> to vector<8xf32>
    %74 = vector.shape_cast %73 : vector<8xf32> to vector<8x1xf32>
    %cst_28 = arith.constant dense<0.000000e+00> : vector<8x8xf32>
    %75 = tpu.matmul %72, %63, %cst_28 {dimension_numbers = #tpu.dot_dimension_numbers<[1], [0], [0], [1], [0, 0, 1, 1], [], []>} : vector<8x8xf32>, vector<8x8xf32>, vector<8x8xf32> -> vector<8x8xf32>
    %76 = tpu.reciprocal %74 : vector<8x1xf32> -> vector<8x1xf32>
    %77 = vector.broadcast %76 : vector<8x1xf32> to vector<8x8xf32>
    %78 = arith.mulf %75, %77 : vector<8x8xf32>
    %79 = tpu.concatenate %24, %42, %60, %78 in 1 : vector<8x8xf32>, vector<8x8xf32>, vector<8x8xf32>, vector<8x8xf32> -> vector<8x32xf32>
    %c0_29 = arith.constant 0 : index
    %c0_30 = arith.constant 0 : index
    %80 = vector.load %arg5[%c0_29, %c0_30] : memref<32x32xf32, #tpu.memory_space<vmem>>, vector<32x32xf32>
    %cst_31 = arith.constant dense<0.000000e+00> : vector<8x32xf32>
    %81 = tpu.matmul %79, %80, %cst_31 {dimension_numbers = #tpu.dot_dimension_numbers<[1], [1], [0], [0], [0, 0, 1, 0], [], []>} : vector<8x32xf32>, vector<32x32xf32>, vector<8x32xf32> -> vector<8x32xf32>
    %c0_32 = arith.constant 0 : index
    %c0_33 = arith.constant 0 : index
    %c0_34 = arith.constant 0 : index
    %82 = vector.load %arg6[%c0_32, %c0_33, %c0_34] : memref<1x8x32xf32, #tpu.memory_space<vmem>>, vector<1x8x32xf32>
    %83 = vector.shape_cast %82 : vector<1x8x32xf32> to vector<8x32xf32>
    %84 = vector.shape_cast %81 : vector<8x32xf32> to vector<1x8x32xf32>
    tpu.vector_store %arg6[%c0_32, %c0_33, %c0_34], %84 {strides = array<i32>} : memref<1x8x32xf32, #tpu.memory_space<vmem>>, vector<1x8x32xf32>,
    return
  }
  func.func @transform_0(%arg0: i32) -> (i32, i32, i32) {
    %c0_i32 = arith.constant 0 : i32
    %c0_i32_0 = arith.constant 0 : i32
    %c0_i32_1 = arith.constant 0 : i32
    return %arg0, %c0_i32, %c0_i32_0 : i32, i32, i32
  }
  func.func @transform_1(%arg0: i32) -> (i32, i32, i32) {
    %c0_i32 = arith.constant 0 : i32
    %c0_i32_0 = arith.constant 0 : i32
    %c0_i32_1 = arith.constant 0 : i32
    return %arg0, %c0_i32, %c0_i32_0 : i32, i32, i32
  }
  func.func @transform_2(%arg0: i32) -> (i32, i32, i32) {
    %c0_i32 = arith.constant 0 : i32
    %c0_i32_0 = arith.constant 0 : i32
    %c0_i32_1 = arith.constant 0 : i32
    return %arg0, %c0_i32, %c0_i32_0 : i32, i32, i32
  }
  func.func @transform_3(%arg0: i32) -> (i32, i32) {
    %c0_i32 = arith.constant 0 : i32
    %c0_i32_0 = arith.constant 0 : i32
    %c0_i32_1 = arith.constant 0 : i32
    return %c0_i32, %c0_i32_0 : i32, i32
  }
  func.func @transform_4(%arg0: i32) -> (i32, i32) {
    %c0_i32 = arith.constant 0 : i32
    %c0_i32_0 = arith.constant 0 : i32
    %c0_i32_1 = arith.constant 0 : i32
    return %c0_i32, %c0_i32_0 : i32, i32
  }
  func.func @transform_5(%arg0: i32) -> (i32, i32, i32) {
    %c0_i32 = arith.constant 0 : i32
    %c0_i32_0 = arith.constant 0 : i32
    %c0_i32_1 = arith.constant 0 : i32
    return %arg0, %c0_i32, %c0_i32_0 : i32, i32, i32
  }
}

</mosaic_0001>

<bundles_post_ra>
// kernel: tpu_custom_call.1
= control target key start
LH: loop header
LB: loop body
LE: loop exit
PB: predicated region body
PF: predicated region fallthrough
CT: control target
= control target key end

     0   :  { %s1533_s0 = inlined_call_operand.hbm [shape: f32[2,8,32], index: 0, kind: input, shape index: {}]   ;;  %s1534_s1 = inlined_call_operand.hbm [shape: f32[2,8,32], index: 1, kind: input, shape index: {}]   ;;  %s1535_s2 = inlined_call_operand.hbm [shape: f32[2,8,32], index: 2, kind: input, shape index: {}]   ;;  %s1536_s3 = inlined_call_operand.hbm [shape: f32[8,8], index: 3, kind: input, shape index: {}]   ;;  %s1537_s4 = inlined_call_operand.hbm [shape: f32[32,32], index: 4, kind: input, shape index: {}]   ;;  %s1538_s5 = inlined_call_operand.hbm [shape: f32[2,8,32], index: 5, kind: output, shape index: {}]  }
   0x1   :  { %1544 = sst [smem:[#allocation19_spill]] %s1534_s1 }
   0x2   :  { %1545 = sst [smem:[#allocation20_spill]] %s1536_s3 }
   0x3   :  { %10 = vsyncpa [#allocation3], 0 }
   0x4   :  { %12 = vsyncpa [#allocation3 + $0x1], 0 }
   0x5   :  { %13 = vsyncpa [#allocation6], 0 }
   0x6   :  { %15 = vsyncpa [#allocation6 + $0x1], 0 }
   0x7   :  { %16 = vsyncpa [#allocation9], 0 }
   0x8   :  { %17 = vsyncpa [#allocation4], 0 }
   0x9   :  { %19 = vsyncpa [#allocation4 + $0x1], 0  ;;  %s1281_s18 = smov 0   ;;  %s1283_s19 = smov 0  }
   0xa   :  { %s1285_s20 = smov 0   ;;  %s1287_s21 = smov 0  }
   0xb LB: > { %1546 = sst [smem:[#allocation16_spill]] %s1239_s21  ;;  %s1302_s22 = sadd.s32 4294967295, %s1239_s21   ;;  %s1239_s21 = sphi %s1287_s21, %s1562_s21   ;;  %s1235_s20 = sphi %s1285_s20, %s1566_s20   ;;  %s1231_s19 = sphi %s1283_s19, %s1565_s19   ;;  %s1227_s18 = sphi %s1281_s18, %s1564_s18  }
   0xc   : > { %s875_s23 = sadd.s32 4294967294, %s1239_s21   ;;  %p45_p0 = scmp.ne.s32.totalorder %s1231_s19, %s1227_s18 }
   0xd   : > { %p1543_p1 = scmp.eq.s32.totalorder %s1302_s22, 0  ;;  %p163_p2 = scmp.eq.s32.totalorder %s1302_s22, 1 }
   0xe   : > { %p169_p3 = scmp.eq.s32.totalorder %s875_s23, 1  ;;  %p876_p5 = scmp.ge.s32.totalorder %s1239_s21, 1 }
   0xf   : > { %p1311_p4 = por %p1543_p1, %p45_p0  ;;  %p176_p7 = scmp.lt.s32.totalorder %s1239_s21, 3 }
  0x10   : > { %p1316_p6 = por %p169_p3, %p45_p0  ;;  %s1549_s3 = sld [smem:[#allocation20_spill]] }
  0x11   : > { %p1324_p8 = pnand %p876_p5, %p176_p7  ;;  %s1241_s30 = smov [#allocation8]  }
  0x12   : > { %s190_s6 = sshll.u32 %s1241_s30, 4  ;;  %s1338_s8 = sadd.s32 1, %s1239_s21   ;;  %s191_s6 = int_to_ptr.vmem [resolvable:$true] %s190_s6 }
  0x13   : > { %p930_p10 = pneg %p1324_p8  ;;  %1552 = sst [smem:[#allocation17_spill]] %s1338_s8 }
  0x14   : > { %s32_s9 = sadd.s32 1, %s1235_s20  ;;  %s29_s10 = ssub.s32 %s1239_s21, %s1338_s8 }
  0x15   : > { %p1333_p11 = pnand %p930_p10, %p1543_p1  ;;  %p30_p12 = scmp.eq.s32.totalorder %s29_s10, 0 }
  0x16   : > { %s188_s28 = sshll.u32 %s1549_s3, 4  ;;  %p39_p13 = scmp.ne.s32.totalorder %s1235_s20, %s1231_s19  ;;  %s189_s28 = int_to_ptr.hbm [resolvable:$true] %s188_s28 }
  0x17   : > { %933 = dma.hbm_to_vmem [thread:$0]  (!%p1333_p11), %s189_s28, 128, %s191_s6, [#allocation9]  }
  0x18   : > { %p40_p0 = scmp.eq.s32.totalorder %s1239_s21, 0  ;;  %p953_p3 = scmp.lt.s32.totalorder %s1239_s21, 2 }
  0x19   : > { %s1350_s11 = scalar_select %p30_p12, %s1235_s20, %s32_s9  }
  0x1a   : > { %p41_p5 = por %p40_p0, %p39_p13  ;;  %p1354_p7 = por %p163_p2, %p39_p13 }
  0x1b   : > { %1553 = sst [smem:[#allocation18_spill]] %s1350_s11  ;;  %s1539_s13 = sand.u32 1, %s1235_s20  }
  0x1c   : > { %s1360_s14 = sshll.u32 %s1239_s21, 3  ;;  %s1364_s15 = sshll.u32 %s1539_s13, 3 }
  0x1d   : > { %p1366_p10 = pnand %p953_p3, %p41_p5  ;;  %s234_s17 = sand.u32 1, %s1239_s21  }
  0x1e   : > { %s1556_s1 = sld [smem:[#allocation19_spill]]  ;;  %s238_s28 = scalar_lea.vmem [#allocation5], %s1364_s15 }
  0x1f   : > { %s246_s30 = sshll.u32 %s238_s28, 4  ;;  %s199_s13 = sshll.u32 %s1537_s4, 4  ;;  %s247_s30 = int_to_ptr.vmem [resolvable:$true] %s246_s30  ;;  %s200_s13 = int_to_ptr.hbm [resolvable:$true] %s199_s13 }
  0x20   : > { %s1379_s3 = scalar_lea.sflag [#allocation6], %s234_s17  ;;  %p1049_p12 = pneg %p1366_p10 }
  0x24   : > { %s242_s27 = scalar_lea.hbm %s1556_s1, %s1360_s14 }
  0x25   : > { %s244_s6 = sshll.u32 %s242_s27, 4  ;;  %s1052_s27 = scalar_lea.hbm %s1556_s1, 16  ;;  %s245_s6 = int_to_ptr.hbm [resolvable:$true] %s244_s6 }
  0x26   : > { %s1045_s11 = sshra.s32 %s245_s6, 4  ;;  %s1046_s11 = int_to_ptr.hbm [resolvable:$true] %s1045_s11 }
  0x27   : > { %s1047_s8 = scalar_lea.hbm %s1046_s11, 8  ;;  %p1053_p3 = scmp.lt.s32.totalorder %s1046_s11, %s1556_s1 }
  0x28   : > { %p1048_p2 = scmp.ne.s32.totalorder %s1046_s11, %s1047_s8  ;;  %p1054_p5 = scmp.lt.s32.totalorder %s1052_s27, %s1047_s8 }
  0x2a   : > { %p1050_p13 = pnand %p1049_p12, %p1048_p2  ;;  %p1055_p9 = por %p1054_p5, %p1053_p3 }
  0x2c   : > { %p1051_p0 = pneg %p1050_p13 }
  0x2e   : > { %p1056_p1 = pnand %p1055_p9, %p1051_p0 }
  0x30   : > { %1059 = shalt.err (!%p1056_p1)
}
  0x31   : > { %943 = dma.hbm_to_vmem [thread:$0]  (!%p1366_p10), %s245_s6, 128, %s247_s30, %s1379_s3  }
  0x32   : > { %s1242_s17 = smov [#allocation10]   ;;  %s1243_s10 = smov 128  }
  0x33   : > { %s201_s9 = sshll.u32 %s1242_s17, 4  ;;  %s1244_s21 = smov 8   ;;  %s202_s9 = int_to_ptr.vmem [resolvable:$true] %s201_s9 }
  0x34   : > { %936 = dma.hbm_to_vmem [thread:$0]  (!%p1333_p11), %s200_s13, 512, %s202_s9, [#allocation9], %s1243_s10, %s1243_s10, %s1244_s21  }
  0x35   : > { %s223_s23 = scalar_lea.hbm %s1533_s0, %s1360_s14  ;;  %s219_s26 = scalar_lea.vmem [#allocation2], %s1364_s15 }
  0x36   : > { %s227_s27 = sshll.u32 %s219_s26, 4  ;;  %s225_s28 = sshll.u32 %s223_s23, 4  ;;  %s228_s27 = int_to_ptr.vmem [resolvable:$true] %s227_s27  ;;  %s226_s28 = int_to_ptr.hbm [resolvable:$true] %s225_s28 }
  0x37   : > { %s1557_s1 = sand.u32 1, %s1235_s20   ;;  %s1105_s6 = sshra.s32 %s226_s28, 4  ;;  %s1106_s6 = int_to_ptr.hbm [resolvable:$true] %s1105_s6 }
  0x38   : > { %s216_s30 = scalar_lea.sflag [#allocation3], %s1557_s1  ;;  %s1107_s17 = scalar_lea.hbm %s1106_s6, 8 }
  0x39   : > { %p1108_p1 = scmp.ne.s32.totalorder %s1106_s6, %s1107_s17  ;;  %s1112_s9 = scalar_lea.hbm %s1533_s0, 16 }
  0x3a   : > { %p1113_p11 = scmp.lt.s32.totalorder %s1106_s6, %s1533_s0  ;;  %p1114_p13 = scmp.lt.s32.totalorder %s1112_s9, %s1107_s17 }
  0x3b   : > { %p1110_p9 = pnand %p1108_p1, %p1049_p12 }
  0x3c   : > { %p1115_p0 = por %p1114_p13, %p1113_p11 }
  0x3d   : > { %p1111_p2 = pneg %p1110_p9 }
  0x3f   : > { %p1116_p3 = pnand %p1115_p0, %p1111_p2 }
  0x41   : > { %1119 = shalt.err (!%p1116_p3)
}
  0x42   : > { %940 = dma.hbm_to_vmem [thread:$0]  (!%p1366_p10), %s226_s28, 128, %s228_s27, %s216_s30  }
  0x43   : > { %s261_s11 = scalar_lea.hbm %s1535_s2, %s1360_s14  ;;  %s257_s23 = scalar_lea.vmem [#allocation7], %s1364_s15 }
  0x44   : > { %s265_s26 = sshll.u32 %s257_s23, 4  ;;  %s263_s7 = sshll.u32 %s261_s11, 4  ;;  %s266_s26 = int_to_ptr.vmem [resolvable:$true] %s265_s26  ;;  %s264_s7 = int_to_ptr.hbm [resolvable:$true] %s263_s7 }
  0x45   : > { %s1135_s6 = sshra.s32 %s264_s7, 4  ;;  %s1142_s27 = scalar_lea.hbm %s1535_s2, 16  ;;  %s1136_s6 = int_to_ptr.hbm [resolvable:$true] %s1135_s6 }
  0x46   : > { %s1137_s17 = scalar_lea.hbm %s1136_s6, 8  ;;  %p1143_p2 = scmp.lt.s32.totalorder %s1136_s6, %s1535_s2 }
  0x47   : > { %p1138_p5 = scmp.ne.s32.totalorder %s1136_s6, %s1137_s17  ;;  %p1144_p11 = scmp.lt.s32.totalorder %s1142_s27, %s1137_s17 }
  0x49   : > { %p1140_p1 = pnand %p1138_p5, %p1049_p12  ;;  %p1145_p13 = por %p1144_p11, %p1143_p2 }
  0x4b   : > { %p1141_p9 = pneg %p1140_p1 }
  0x4d   : > { %p1146_p0 = pnand %p1145_p13, %p1141_p9 }
  0x4f   : > { %1149 = shalt.err (!%p1146_p0)
}
  0x50   : > { %946 = dma.hbm_to_vmem [thread:$0]  (!%p1366_p10), %s264_s7, 128, %s266_s26, %s1379_s3  }
  0x51   : > { %274 = sbr.rel (%p1324_p8) target bundleno = 1149 (0x47d), region = 40  ;;  %s1435_s14 = sand.u32 (!%p1324_p8), 1, %s1231_s19  }
  0x52   : > { %s1438_s15 = sshll.u32 (!%p1324_p8), %s1435_s14, 3  ;;  %s277_s10 = scalar_lea.sflag (!%p1324_p8), [#allocation3], %s1435_s14 }
  0x53   : > { %s280_s21 = scalar_lea.vmem (!%p1324_p8), [#allocation2], %s1438_s15 }
  0x56   : > { %1210 = dma.done.wait (%p1311_p4), %s277_s10, 128  }
  0x57   : > { %1212 = vsyncadd (%p1311_p4), %s277_s10, 4294967168  ;;  %s286_s3 = sand.u32 1, %s1302_s22   ;;  %s290_s16 = scalar_lea.vmem [#allocation5], %s1438_s15 }
  0x58   : > { %s287_s29 = scalar_lea.sflag [#allocation6], %s286_s3 }
  0x59   : > { %1214 = dma.done.wait (%p1311_p4), %s287_s29, 256  }
  0x5a   : > { %1216 = vsyncadd (%p1311_p4), %s287_s29, 4294967040  ;;  %s300_s1 = scalar_lea.vmem [#allocation7], %s1438_s15  ;;  %p1558_p8 = scmp.eq.s32.totalorder %s1302_s22, 0 }
  0x5c   : > { %1218 = dma.done.wait (%p1558_p8), [#allocation9], 640   ;;  %p1559_p10 = pmov %p1558_p8 }
  0x5d   : > { %v349_v0 = vld [vmem:[%s290_s16] sm:$0xff]  ;;  %s1245_s8 = smov 120   ;;  %s1246_s11 = smov 112   ;;  %v348_v1 = vld [vmem:[%s280_s21] sm:$0xff]  ;;  %vm352_vm0 = vcmask 64512   ;;  %vm690_vm9 = vcmask 261120  }
  0x5e   : > { %1220 = vsyncadd (%p1559_p10), [#allocation9], 4294966656  ;;  %430 = vrot.lane.b32.xlu0 %v349_v0, %s1245_s8  ;;  %511 = vrot.lane.b32.xlu2 %v349_v0, %s1246_s11  ;;  %s1247_s24 = smov 104   ;;  %v350_v8 = vld [vmem:[%s300_s1] sm:$0xff]  ;;  %v1469_v11 = vld [vmem:[#allocation8] sm:$0xff]  ;;  %s1248_s23 = smov 8  }
  0x5f   : > { %893 = vmatpush.xpose.msk.msra.mxu0 %vm352_vm0, %v349_v0  ;;  %408 = vmatpush.msra.mxu1 %v350_v8  ;;  %s1249_s26 = smov 24   ;;  %s1250_s7 = smov 16  }
  0x60   : > { %s911_s6 = sshll.u32 %s1302_s22, 3  ;;  %s347_s27 = scalar_lea.vmem [#allocation11], %s1438_s15 }
  0x61   : > { %s738_s9 = scalar_lea.hbm %s1538_s5, %s911_s6  ;;  %s740_s28 = sshll.u32 %s347_s27, 4  ;;  %s741_s28 = int_to_ptr.vmem [resolvable:$true] %s740_s28 }
  0x62   : > { %894 = vmatmul.msk.f32.vlgmr.msra.gmra.mxu0 %vm352_vm0, %v348_v1  ;;  %s742_s30 = sshll.u32 %s738_s9, 4  ;;  %s728_s10 = scalar_lea.sflag [#allocation4], %s1435_s14  ;;  %s743_s30 = int_to_ptr.hbm [resolvable:$true] %s742_s30 }
  0x63   : > { %s1179_s21 = sshra.s32 %s743_s30, 4  ;;  %s1185_s16 = scalar_lea.hbm %s1538_s5, 16  ;;  %s1180_s21 = int_to_ptr.hbm [resolvable:$true] %s1179_s21 }
  0x64   : > { %s1181_s3 = scalar_lea.hbm %s1180_s21, 8  ;;  %p1186_p5 = scmp.lt.s32.totalorder %s1180_s21, %s1538_s5 }
  0x65   : > { %p1182_p4 = scmp.ne.s32.totalorder %s1180_s21, %s1181_s3  ;;  %p1187_p1 = scmp.lt.s32.totalorder %s1185_s16, %s1181_s3 }
  0x66   : > { %428 = vrot.lane.b32.xlu0 %v348_v1, %s1245_s8  ;;  %509 = vrot.lane.b32.xlu2 %v348_v1, %s1246_s11 }
  0x67   : > { %p1183_p12 = pnand %p1182_p4, %p1354_p7  ;;  %p1188_p9 = por %p1187_p1, %p1186_p5 }
  0x69   : > { %p1184_p3 = pneg %p1183_p12 }
  0x6b   : > { %p1189_p2 = pnand %p1188_p9, %p1184_p3 }
  0x6e   : > { %591 = vrot.lane.b32.xlu0 %v349_v0, %s1247_s24  ;;  %589 = vrot.lane.b32.xlu2 %v348_v1, %s1247_s24 }
  0xb8   : > { %v512_v2 = vpop.permute.xlu2 %511 }
  0xc0   : > { %v510_v4 = vpop.permute.xlu2 %509 }
  0xc8   : > { %v590_v7 = vpop.permute.xlu2 %589 }
  0xd0   : > { %v431_v3 = vpop.permute.xlu0 %430 }
  0xd1   : > { %896 = vmatpush.xpose.msk.msra.mxu2 %vm352_vm0, %v431_v3 }
  0xd8   : > { %v429_v5 = vpop.permute.xlu0 %428 }
  0xd9   : > { %897 = vmatmul.msk.f32.vlgmr.msra.gmra.mxu2 %vm352_vm0, %v429_v5 }
  0xdf   : > { %v376_v9 = vpop.f32.mrf.mxu0 }
  0xe0   : > { %v592_v6 = vpop.permute.xlu0 %591  ;;  %v379_v19 = vmul.f32 0.35355338, %v376_v9 }
  0xe1   : > { %902 = vmatpush.xpose.msk.msrb.mxu0 %vm352_vm0, %v592_v6 }
  0xe2   : > { %v380_v22 = vadd.f32 %v379_v19, %v1469_v11 }
  0xe4   : > { %903 = vmatmul.msk.f32.vlgmr.msrb.gmra.mxu0 %vm352_vm0, %v590_v7  ;;  %v381_v24 = vsel %vm352_vm0, %v380_v22, -inf }
 0x15c   : > { %v453_v10 = vpop.f32.mrf.mxu2 }
 0x15d   : > { %v456_v12 = vmul.f32 0.35355338, %v453_v10 }
 0x15f   : > { %v457_v13 = vadd.f32 %v456_v12, %v1469_v11  ;;  %v688_v12 = vld [vmem:[#allocation10 + $0x10] sm:$0xff] }
 0x161   : > { %v458_v14 = vsel %vm352_vm0, %v457_v13, -inf  ;;  %v614_v15 = vpop.f32.mrf.mxu0 }
 0x162   : > { %459 = vmax.xlane.f32.xlu1 %v458_v14  ;;  %v617_v16 = vmul.f32 0.35355338, %v614_v15  ;;  %v686_v15 = vld [vmem:[#allocation10] sm:$0xff] }
 0x164   : > { %v618_v17 = vadd.f32 %v617_v16, %v1469_v11 }
 0x166   : > { %v619_v18 = vsel %vm352_vm0, %v618_v17, -inf }
 0x167   : > { %620 = vmax.xlane.f32.xlu2 %v619_v18 }
 0x17b   : > { %468 = vrot.lane.b32.xlu1 %v350_v8, %s1245_s8 }
 0x183   : > { %548 = vrot.lane.b32.xlu1 %v350_v8, %s1246_s11 }
 0x18b   : > { %628 = vrot.lane.b32.xlu1 %v350_v8, %s1247_s24 }
 0x1b5   : > { %382 = vmax.xlane.f32.xlu1 %v381_v24 }
 0x1d5   : > { %v460_v20 = vpop.xlane.xlu1 %459 }
 0x1d6   : > { %v461_v21 = vsub.f32 %v457_v13, %v460_v20  ;;  %v687_v13 = vld [vmem:[#allocation10 + $0x8] sm:$0xff] }
 0x1d8   : > { %v462_v23 = vmul.f32 1.442695, %v461_v21 }
 0x1da   : > { %999 = vpow2.f32 %v462_v23  ;;  %v621_v25 = vpop.xlane.xlu2 %620 }
 0x1db   : > { %v622_v26 = vsub.f32 %v618_v17, %v621_v25 }
 0x1dd   : > { %v623_v27 = vmul.f32 1.442695, %v622_v26 }
 0x1df   : > { %1001 = vpow2.f32 %v623_v27 }
 0x1e0   : > { %v1000_v28 = vpop.eup %999 }
 0x1e1   : > { %v464_v29 = vsel %vm352_vm0, %v1000_v28, 0.0 }
 0x1e2   : > { %465 = vadd.xlane.f32.xlu2 %v464_v29 }
 0x1e5   : > { %v1002_v30 = vpop.eup %1001 }
 0x1e6   : > { %v625_v31 = vsel %vm352_vm0, %v1002_v30, 0.0 }
 0x1ea   : > { %626 = vadd.xlane.f32.xlu2 %v625_v31 }
 0x1ed   : > { %v469_v32 = vpop.permute.xlu1 %468 }
 0x1ee   : > { %489 = vmatpush.msra.mxu3 %v469_v32 }
 0x1ef   : > { %898 = vmatmul.msk.f32.vlgmr.msra.gmra.mxu3 %vm352_vm0, %v1000_v28 }
 0x1f0   : > { %899 = vmatpush.xpose.msk.msrb.mxu3 %vm352_vm0, %v512_v2 }
 0x1f5   : > { %v549_v33 = vpop.permute.xlu1 %548 }
 0x1f6   : > { %569 = vmatpush.msra.mxu3 %v549_v33 }
 0x1f7   : > { %900 = vmatmul.msk.f32.vlgmr.msrb.gmra.mxu3 %vm352_vm0, %v510_v4 }
 0x1fd   : > { %v629_v34 = vpop.permute.xlu1 %628 }
 0x1fe   : > { %649 = vmatpush.msrb.mxu2 %v629_v34 }
 0x1ff   : > { %904 = vmatmul.msk.f32.vlgmr.msrb.gmra.mxu2 %vm352_vm0, %v1002_v30 }
 0x228   : > { %v383_v36 = vpop.xlane.xlu1 %382 }
 0x229   : > { %v384_v37 = vsub.f32 %v380_v22, %v383_v36 }
 0x22b   : > { %v385_v38 = vmul.f32 1.442695, %v384_v37 }
 0x255   : > { %v466_v35 = vpop.xlane.xlu2 %465 }
 0x256   : > { %1003 = vrcp.f32 %v466_v35  ;;  %v505_v45 = vand.u32 2147483648, %v466_v35  ;;  %vm499_vm2 = vweird.f32 %v466_v35  ;;  %v503_v46 = vand.u32 2147483647, %v466_v35 }
 0x257   : > { %1005 = vpow2.f32 %v385_v38 }
 0x258   : > { %v506_v48 = vor.u32 1.1754944e-38, %v505_v45  ;;  %vm504_vm4 = vcmp.eq.f32.partialorder %v503_v46, 8.507059e+37 }
 0x25c   : > { %v1004_v39 = vpop.eup %1003 }
 0x25d   : > { %v495_v40 = vmul.f32 %v1004_v39, %v466_v35  ;;  %v1006_v41 = vpop.eup %1005  ;;  %vm500_vm1 = vweird.f32 %v1004_v39  ;;  %v627_v56 = vpop.xlane.xlu2 %626 }
 0x25e   : > { %895 = vmatmul.msk.f32.vlgmr.msra.gmra.mxu1 %vm352_vm0, %v1006_v41  ;;  %vm501_vm3 = vmor %vm499_vm2, %vm500_vm1  ;;  %1007 = vrcp.f32 %v627_v56  ;;  %vm659_vm5 = vweird.f32 %v627_v56  ;;  %v663_v61 = vand.u32 2147483647, %v627_v56  ;;  %v665_v62 = vand.u32 2147483648, %v627_v56 }
 0x25f   : > { %v496_v42 = vsub.f32 1.0, %v495_v40  ;;  %v387_v10 = vsel %vm352_vm0, %v1006_v41, 0.0 }
 0x260   : > { %vm664_vm8 = vcmp.eq.f32.partialorder %v663_v61, 8.507059e+37  ;;  %v666_v1 = vor.u32 1.1754944e-38, %v665_v62 }
 0x261   : > { %v497_v43 = vmul.f32 %v1004_v39, %v496_v42 }
 0x263   : > { %v498_v44 = vadd.f32 %v1004_v39, %v497_v43 }
 0x264   : > { %v1008_v57 = vpop.eup %1007 }
 0x265   : > { %v502_v47 = vsel %vm501_vm3, %v1004_v39, %v498_v44  ;;  %v655_v58 = vmul.f32 %v1008_v57, %v627_v56  ;;  %vm660_vm6 = vweird.f32 %v1008_v57  ;;  %vm682_vm3 = vcmask 130048  }
 0x266   : > { %v507_v50 = vsel %vm504_vm4, %v506_v48, %v502_v47  ;;  %vm661_vm7 = vmor %vm659_vm5, %vm660_vm6  ;;  %vm684_vm4 = vcmask 195584  }
 0x267   : > { %v656_v59 = vsub.f32 1.0, %v655_v58 }
 0x269   : > { %v657_v60 = vmul.f32 %v1008_v57, %v656_v59 }
 0x26b   : > { %v658_v63 = vadd.f32 %v1008_v57, %v657_v60 }
 0x26d   : > { %v662_v2 = vsel %vm661_vm7, %v1008_v57, %v658_v63 }
 0x26e   : > { %v667_v3 = vsel %vm664_vm8, %v666_v1, %v662_v2 }
 0x272   : > { %v491_v49 = vpop.f32.mrf.mxu3 }
 0x273   : > { %v508_v51 = vmul.f32 %v507_v50, %v491_v49 }
 0x275   : > { %670 = vrot.lane.b32.xlu2 %v508_v51, %s1248_s23 }
 0x27a   : > { %v534_v52 = vpop.f32.mrf.mxu3 }
 0x27b   : > { %v537_v53 = vmul.f32 0.35355338, %v534_v52 }
 0x27d   : > { %v538_v54 = vadd.f32 %v537_v53, %v1469_v11  ;;  %v689_v11 = vld [vmem:[#allocation10 + $0x18] sm:$0xff] }
 0x27e   : > { %905 = vmatpush.xpose.msk.msrb.mxu1 %vm690_vm9, %v689_v11 }
 0x27f   : > { %v539_v55 = vsel %vm352_vm0, %v538_v54, -inf }
 0x280   : > { %540 = vmax.xlane.f32.xlu0 %v539_v55 }
 0x282   : > { %v651_v0 = vpop.f32.mrf.mxu2  ;;  %906 = vmatpush.xpose.msk.msrb.mxu1 %vm690_vm9, %v688_v12 }
 0x283   : > { %v668_v4 = vmul.f32 %v667_v3, %v651_v0 }
 0x285   : > { %678 = vrot.lane.b32.xlu1 %v668_v4, %s1249_s26 }
 0x286   : > { %907 = vmatpush.xpose.msk.msrb.mxu1 %vm690_vm9, %v687_v13 }
 0x28a   : > { %908 = vmatpush.xpose.msk.msrb.mxu1 %vm690_vm9, %v686_v15 }
 0x2cf   : > { %v671_v41 = vpop.permute.xlu2 %670 }
 0x2db   : > { %v410_v39 = vpop.f32.mrf.mxu1 }
 0x2f3   : > { %v541_v5 = vpop.xlane.xlu0 %540 }
 0x2f4   : > { %v542_v6 = vsub.f32 %v538_v54, %v541_v5 }
 0x2f6   : > { %v543_v7 = vmul.f32 1.442695, %v542_v6 }
 0x2f7   : > { %v679_v44 = vpop.permute.xlu1 %678 }
 0x2f8   : > { %1009 = vpow2.f32 %v543_v7 }
 0x2fe   : > { %v1010_v8 = vpop.eup %1009 }
 0x2ff   : > { %901 = vmatmul.msk.f32.vlgmr.msra.gmra.mxu3 %vm352_vm0, %v1010_v8  ;;  %v545_v9 = vsel %vm352_vm0, %v1010_v8, 0.0 }
 0x300   : > { %546 = vadd.xlane.f32.xlu0 %v545_v9 }
 0x308   : > { %388 = vadd.xlane.f32.xlu0 %v387_v10 }
 0x373   : > { %v547_v14 = vpop.xlane.xlu0 %546 }
 0x374   : > { %1011 = vrcp.f32 %v547_v14  ;;  %v585_v19 = vand.u32 2147483648, %v547_v14  ;;  %v583_v21 = vand.u32 2147483647, %v547_v14  ;;  %vm579_vm11 = vweird.f32 %v547_v14 }
 0x376   : > { %v586_v23 = vor.u32 1.1754944e-38, %v585_v19  ;;  %vm584_vm13 = vcmp.eq.f32.partialorder %v583_v21, 8.507059e+37 }
 0x37a   : > { %v1012_v16 = vpop.eup %1011 }
 0x37b   : > { %v575_v17 = vmul.f32 %v1012_v16, %v547_v14  ;;  %vm580_vm10 = vweird.f32 %v1012_v16  ;;  %v389_v28 = vpop.xlane.xlu0 %388 }
 0x37c   : > { %vm581_vm12 = vmor %vm579_vm11, %vm580_vm10  ;;  %1013 = vrcp.f32 %v389_v28  ;;  %v424_v34 = vand.u32 2147483648, %v389_v28  ;;  %vm418_vm15 = vweird.f32 %v389_v28  ;;  %v422_v35 = vand.u32 2147483647, %v389_v28 }
 0x37d   : > { %v576_v18 = vsub.f32 1.0, %v575_v17 }
 0x37e   : > { %v425_v37 = vor.u32 1.1754944e-38, %v424_v34  ;;  %vm423_vm2 = vcmp.eq.f32.partialorder %v422_v35, 8.507059e+37 }
 0x37f   : > { %v577_v20 = vmul.f32 %v1012_v16, %v576_v18 }
 0x381   : > { %v578_v22 = vadd.f32 %v1012_v16, %v577_v20 }
 0x382   : > { %v571_v25 = vpop.f32.mrf.mxu3  ;;  %v1014_v29 = vpop.eup %1013 }
 0x383   : > { %v582_v24 = vsel %vm581_vm12, %v1012_v16, %v578_v22  ;;  %v414_v30 = vmul.f32 %v1014_v29, %v389_v28  ;;  %vm419_vm14 = vweird.f32 %v1014_v29 }
 0x384   : > { %v587_v26 = vsel %vm584_vm13, %v586_v23, %v582_v24  ;;  %vm420_vm1 = vmor %vm418_vm15, %vm419_vm14 }
 0x385   : > { %v588_v27 = vmul.f32 %v587_v26, %v571_v25  ;;  %v415_v31 = vsub.f32 1.0, %v414_v30 }
 0x387   : > { %674 = vrot.lane.b32.xlu0 %v588_v27, %s1250_s7  ;;  %v416_v32 = vmul.f32 %v1014_v29, %v415_v31 }
 0x389   : > { %v417_v33 = vadd.f32 %v1014_v29, %v416_v32 }
 0x38b   : > { %v421_v36 = vsel %vm420_vm1, %v1014_v29, %v417_v33 }
 0x38c   : > { %v426_v38 = vsel %vm423_vm2, %v425_v37, %v421_v36 }
 0x38d   : > { %v427_v40 = vmul.f32 %v426_v38, %v410_v39 }
 0x38f   : > { %v681_v42 = vsel %vm352_vm0, %v427_v40, %v671_v41 }
 0x3f9   : > { %v675_v43 = vpop.permute.xlu0 %674 }
 0x3fa   : > { %v683_v45 = vsel %vm682_vm3, %v681_v42, %v675_v43 }
 0x3fb   : > { %v685_v46 = vsel %vm684_vm4, %v683_v45, %v679_v44 }
 0x3fc   : > { %909 = vmatmul.msk.f32.vlgmr.msrb.gmra.mxu1 %vm690_vm9, %v685_v46 }
 0x479   : > { %v723_v47 = vpop.f32.mrf.mxu1 }
 0x47a   : > { %726 = vst.msk [vmem:[%s347_s27] sm:$0xff] %vm690_vm9, %v723_v47 }
 0x47b   : > { %1192 = shalt.err (!%p1189_p2)
}
 0x47c   : > { %928 = dma.vmem_to_hbm [thread:$0]  (%p1354_p7), %s741_s28, 128, %s743_s30, %s728_s10  }
 0x47d PF: > { %s1560_s14 = sld [smem:[#allocation16_spill]]  ;;  %s754_s8 = sand.u32 1, %s1227_s18  }
 0x47e   : > { %s755_s11 = scalar_lea.sflag [#allocation4], %s754_s8 }
 0x483   : > { %p1561_p11 = scmp.ge.s32.totalorder %s1560_s14, 2 }
 0x485   : > { %p948_p13 = pnand %p1561_p11, %p1316_p6 }
 0x487   : > { %p949_p0 = pneg %p948_p13 }
 0x489   : > { %1222 = dma.done.wait (%p949_p0), %s755_s11, 128  }
 0x48a   : > { %1224 = vsyncadd (%p949_p0), %s755_s11, 4294967168  ;;  %s1562_s21 = sld [smem:[#allocation17_spill]]  ;;  %s1564_s18 = smov %s1231_s19 }
 0x48b   : > { %s1563_s24 = sld [smem:[#allocation18_spill]]  ;;  %s1565_s19 = smov %s1235_s20 }
 0x490   : > { %p22_p8 = scmp.ge.s32.totalorder %s1562_s21, 4  }
 0x491   : > { %s1566_s20 = smov %s1563_s24 }
 0x492   :  { %24 = sbr.rel (!%p22_p8) target bundleno = 11 (0xb), region = 117 }
 0x497   :  { %761 = vsyncpa [#allocation3], 1 }
 0x498   :  { %763 = vsyncpa [#allocation3 + $0x1], 1 }
 0x499   :  { %764 = vsyncpa [#allocation6], 1 }
 0x49a   :  { %766 = vsyncpa [#allocation6 + $0x1], 1 }
 0x49b   :  { %767 = vsyncpa [#allocation9], 1 }
 0x49c   :  { %768 = vsyncpa [#allocation4], 1 }
 0x49d   :  { %770 = vsyncpa [#allocation4 + $0x1], 1 }

</bundles_post_ra>
